<compile_context>
chip_gen: v6e
topology: v6e:2x2x1
jax: 0.10.0
libtpu: 0.0.40
codegen_flags: <defaults>
</compile_context>

<pallas_src>
import jax
import jax.numpy as jnp
from jax.experimental import pallas as pl
from jax.experimental.pallas import tpu as pltpu

_LANE = 128      # lane width: output features padded to this for lane-dense stores
_SUBLANE = 8     # sublane granularity for the batch tile


def _round_up(n, m):
    return ((n + m - 1) // m) * m


def _linear_kernel(x_ref, w_ref, b_ref, o_ref):
    # One MXU matmul per batch tile, f32 accumulation, broadcast bias add.
    acc = jnp.dot(x_ref[...], w_ref[...], preferred_element_type=jnp.float32)
    o_ref[...] = (acc + b_ref[...]).astype(o_ref.dtype)


def _vmem_budget_bytes(tb, d, o_pad, x_itemsize, out_itemsize):
    # Honest VMEM accounting: the K dim is lane-padded in VMEM (784 -> 896).
    d_pad = _round_up(d, _LANE)
    x_tiles = 2 * tb * d_pad * x_itemsize        # streamed x, double-buffered
    o_tiles = 2 * tb * o_pad * out_itemsize      # output tile, double-buffered
    w_tiles = 2 * d_pad * o_pad * x_itemsize     # const-index weight still gets 2 bufs
    b_tiles = 2 * 1 * o_pad * 4                  # bias (f32)
    return x_tiles + o_tiles + w_tiles + b_tiles


def logistic_regression_forward(x, weight, bias, *, batch_tile=2048,
                                core_parallel=False):
    """Forward pass of LogisticRegression_F.

    x:      (B, ...) -- flattened to (B, D), same as torch .view(B, -1).
    weight: (D, O)   -- transposed torch layout; out = x @ weight + bias.
    bias:   (O,)

    batch_tile: rows of x per grid step.  Default 2048 (~17 MiB VMEM for
      D=784); the wrapper raises vmem_limit_bytes accordingly so it also
      compiles under v5e's 16 MiB default scoped limit.
    core_parallel: mark the batch grid axis CORE_PARALLEL so v7x's two
      TensorCores each stream half the batch.  Leave False on v5e/v6e.
    """
    B = x.shape[0]
    x2d = x.reshape(B, -1)                 # glue: torch .view(B, -1)
    D, O = weight.shape
    assert x2d.shape[1] == D, (x2d.shape, weight.shape)

    out_dtype = x2d.dtype
    # Only the tiny weight/bias are re-cast; x is consumed as-is (no hidden
    # full-array astype pass -- pass bf16 x from the producer for bf16 speed).
    weight = weight.astype(x2d.dtype)

    # Lane-dense output: pad O up to a multiple of 128 (zeros), trim at the end.
    O_pad = _round_up(O, _LANE)
    if O_pad != O:
        weight = jnp.pad(weight, ((0, 0), (0, O_pad - O)))
        bias = jnp.pad(bias, (0, O_pad - O))
    b2d = bias.reshape(1, O_pad).astype(jnp.float32)

    # Batch tiling WITHOUT materializing any pad of x:
    #   * B <= tile  -> a single block covering the full batch (block shape ==
    #     full array dim is always legal, even if B is not a sublane multiple).
    #   * otherwise  -> TB is a sublane multiple and the grid is cdiv(B, TB);
    #     the ragged last tile's OOB rows are masked on the output write and
    #     never appear in the (B, O_pad) result.
    TB = _round_up(max(int(batch_tile), _SUBLANE), _SUBLANE)
    if B <= TB:
        TB = B
    grid = (pl.cdiv(B, TB),)

    vmem_limit = _vmem_budget_bytes(TB, D, O_pad, x2d.dtype.itemsize,
                                    jnp.dtype(out_dtype).itemsize)
    vmem_limit = min(max(32 << 20, vmem_limit + (4 << 20)), 56 << 20)

    if core_parallel:
        dim_sem = (pltpu.CORE_PARALLEL,)   # shard batch axis across v7x's 2 TCs
    else:
        dim_sem = ("parallel",)

    out = pl.pallas_call(
        _linear_kernel,
        out_shape=jax.ShapeDtypeStruct((B, O_pad), out_dtype),
        grid_spec=pl.GridSpec(
            grid=grid,
            in_specs=[
                pl.BlockSpec((TB, D), lambda i: (i, 0)),      # streamed x
                pl.BlockSpec((D, O_pad), lambda i: (0, 0)),   # VMEM-resident weight
                pl.BlockSpec((1, O_pad), lambda i: (0, 0)),   # VMEM-resident bias
                # NOTE: pipeline_mode=pl.Buffered(1) on weight/bias saves ~0.5 MiB
                # if TB is pushed toward v7x's 64 MiB VMEM ceiling.
            ],
            out_specs=pl.BlockSpec((TB, O_pad), lambda i: (i, 0)),
        ),
        compiler_params=pltpu.CompilerParams(
            dimension_semantics=dim_sem,
            vmem_limit_bytes=vmem_limit,
        ),
    )(x2d, weight, b2d)

    return out if O_pad == O else out[:, :O]


def init_params(key, input_dim=784, output_dim=10, dtype=jnp.float32):
    # Deterministic init mirroring torch.nn.Linear default: U(-1/sqrt(D), 1/sqrt(D)).
    kw, kb = jax.random.split(key)
    bound = 1.0 / jnp.sqrt(jnp.array(input_dim, dtype))
    weight = jax.random.uniform(kw, (input_dim, output_dim), dtype, -bound, bound)
    bias = jax.random.uniform(kb, (output_dim,), dtype, -bound, bound)
    return weight, bias


if __name__ == "__main__":
    key = jax.random.PRNGKey(0)
    k_x, k_p = jax.random.split(key)

    input_dim, output_dim = 784, 10
    batch = 2
    # MNIST-like input (B, 1, 28, 28); forward flattens it to (B, 784).
    x = jax.random.normal(k_x, (batch, 1, 28, 28), dtype=jnp.float32)
    weight, bias = init_params(k_p, input_dim, output_dim)

    # Plain-JAX reference.
    ref = x.reshape(batch, -1) @ weight + bias

    # f32 path: matches the reference.
    out_f32 = jax.block_until_ready(logistic_regression_forward(x, weight, bias))
    assert out_f32.shape == (batch, output_dim)
    assert jnp.allclose(out_f32, ref, atol=1e-5, rtol=1e-5)

    # bf16 path: x arrives in bf16 at the kernel boundary (no hidden wrapper
    # cast), f32 accumulation -> looser tolerance.
    out_bf16 = jax.block_until_ready(
        logistic_regression_forward(x.astype(jnp.bfloat16), weight, bias))
    assert out_bf16.shape == (batch, output_dim)
    assert jnp.allclose(out_bf16.astype(jnp.float32), ref, atol=3e-2, rtol=3e-2)

    print("KERNEL_OK")
</pallas_src>

<mosaic_0001>
module attributes {stable_mosaic.version = 11 : i64} {
  func.func @_linear_kernel(%arg0: i32, %arg1: memref<2x784xf32, #tpu.memory_space<vmem>>, %arg2: memref<784x128xf32, #tpu.memory_space<vmem>>, %arg3: memref<1x128xf32, #tpu.memory_space<vmem>>, %arg4: memref<2x128xf32, #tpu.memory_space<vmem>>) attributes {dimension_semantics = [#tpu.dimension_semantics<parallel>], iteration_bounds = array<i64: 1>, scalar_prefetch = 0 : i64, scratch_operands = 0 : i64, tpu.core_type = #tpu.core_type<tc>, window_params = [{transform_indices = @transform_0, window_bounds = array<i64: 2, 784>}, {pipeline_mode = #tpu.pipeline_mode<synchronous>, transform_indices = @transform_1, window_bounds = array<i64: 784, 128>}, {pipeline_mode = #tpu.pipeline_mode<synchronous>, transform_indices = @transform_2, window_bounds = array<i64: 1, 128>}, {transform_indices = @transform_3, window_bounds = array<i64: 2, 128>}]} {
    %c0 = arith.constant 0 : index
    %c0_0 = arith.constant 0 : index
    %0 = vector.load %arg1[%c0, %c0_0] : memref<2x784xf32, #tpu.memory_space<vmem>>, vector<2x784xf32>
    %c0_1 = arith.constant 0 : index
    %c0_2 = arith.constant 0 : index
    %1 = vector.load %arg2[%c0_1, %c0_2] : memref<784x128xf32, #tpu.memory_space<vmem>>, vector<784x128xf32>
    %cst = arith.constant dense<0.000000e+00> : vector<2x128xf32>
    %2 = tpu.matmul %0, %1, %cst {dimension_numbers = #tpu.dot_dimension_numbers<[1], [0], [0], [1], [0, 0, 1, 1], [], []>} : vector<2x784xf32>, vector<784x128xf32>, vector<2x128xf32> -> vector<2x128xf32>
    %c0_3 = arith.constant 0 : index
    %c0_4 = arith.constant 0 : index
    %3 = vector.load %arg3[%c0_3, %c0_4] : memref<1x128xf32, #tpu.memory_space<vmem>>, vector<1x128xf32>
    %4 = vector.broadcast %3 : vector<1x128xf32> to vector<2x128xf32>
    %5 = arith.addf %2, %4 : vector<2x128xf32>
    %c0_5 = arith.constant 0 : index
    %c0_6 = arith.constant 0 : index
    %6 = vector.load %arg4[%c0_5, %c0_6] : memref<2x128xf32, #tpu.memory_space<vmem>>, vector<2x128xf32>
    tpu.vector_store %arg4[%c0_5, %c0_6], %5 {strides = array<i32>} : memref<2x128xf32, #tpu.memory_space<vmem>>, vector<2x128xf32>,
    return
  }
  func.func @transform_0(%arg0: i32) -> (i32, i32) {
    %c0_i32 = arith.constant 0 : i32
    %c0_i32_0 = arith.constant 0 : i32
    return %arg0, %c0_i32 : i32, i32
  }
  func.func @transform_1(%arg0: i32) -> (i32, i32) {
    %c0_i32 = arith.constant 0 : i32
    %c0_i32_0 = arith.constant 0 : i32
    %c0_i32_1 = arith.constant 0 : i32
    return %c0_i32, %c0_i32_0 : i32, i32
  }
  func.func @transform_2(%arg0: i32) -> (i32, i32) {
    %c0_i32 = arith.constant 0 : i32
    %c0_i32_0 = arith.constant 0 : i32
    %c0_i32_1 = arith.constant 0 : i32
    return %c0_i32, %c0_i32_0 : i32, i32
  }
  func.func @transform_3(%arg0: i32) -> (i32, i32) {
    %c0_i32 = arith.constant 0 : i32
    %c0_i32_0 = arith.constant 0 : i32
    return %arg0, %c0_i32 : i32, i32
  }
}

</mosaic_0001>

<bundles_post_ra>
// kernel: tpu_custom_call.1
= control target key start
LH: loop header
LB: loop body
LE: loop exit
PB: predicated region body
PF: predicated region fallthrough
CT: control target
= control target key end

     0   :  { %8 = vsyncpa [#allocation3], 0  ;;  %s733_s0 = inlined_call_operand.hbm [shape: f32[2,784], index: 0, kind: input, shape index: {}]   ;;  %s734_s1 = inlined_call_operand.hbm [shape: f32[784,128], index: 1, kind: input, shape index: {}]   ;;  %s735_s2 = inlined_call_operand.vmem [shape: f32[1,128], index: 2, kind: input, shape index: {}]   ;;  %s736_s3 = inlined_call_operand.hbm [shape: f32[2,128], index: 3, kind: output, shape index: {}]  }
   0x1   :  { %9 = vsyncpa [#allocation6], 0 }
   0x2   :  { %10 = vsyncpa [#allocation4], 0  ;;  %s682_s12 = smov [#allocation2]   ;;  %s683_s14 = smov [#allocation5]  }
   0x3   :  { %s17_s13 = sshll.u32 %s682_s12, 4  ;;  %s26_s15 = sshll.u32 %s683_s14, 4  ;;  %s18_s13 = int_to_ptr.vmem [resolvable:$true] %s17_s13  ;;  %s27_s15 = int_to_ptr.vmem [resolvable:$true] %s26_s15 }
   0x4   :  { %s624_s16 = scalar_lea.vmem %s18_s13, 224  ;;  %p629_p1 = scmp.lt.s32.totalorder %s18_s13, %s18_s13 }
   0x5   :  { %p625_p0 = scmp.ne.s32.totalorder %s18_s13, %s624_s16  ;;  %p630_p2 = scmp.lt.s32.totalorder %s624_s16, %s624_s16 }
   0x7   :  { %p631_p3 = por %p630_p2, %p629_p1 }
   0x9   :  { %p632_p4 = pnand %p631_p3, %p625_p0 }
   0xb   :  { %635 = shalt.err (!%p632_p4)
}
   0xc   :  { %20 = dma.hbm_to_vmem [thread:$0]  %s733_s0, 224, %s18_s13, [#allocation3]  }
   0xd   :  { %s644_s19 = scalar_lea.vmem %s27_s15, 12544  ;;  %p649_p6 = scmp.lt.s32.totalorder %s27_s15, %s27_s15 }
   0xe   :  { %p645_p5 = scmp.ne.s32.totalorder %s27_s15, %s644_s19  ;;  %p650_p7 = scmp.lt.s32.totalorder %s644_s19, %s644_s19 }
  0x10   :  { %p651_p8 = por %p650_p7, %p649_p6 }
  0x12   :  { %p652_p9 = pnand %p651_p8, %p645_p5 }
  0x14   :  { %655 = shalt.err (!%p652_p9)
}
  0x15   :  { %s684_s20 = smov 128   ;;  %s685_s21 = smov 8  }
  0x16   :  { %32 = dma.hbm_to_vmem [thread:$0]  %s734_s1, 12544, %s27_s15, [#allocation6], %s684_s20, %s684_s20, %s685_s21  }
  0x17   :  { %676 = dma.done.wait [#allocation3], 224  }
  0x18   :  { %677 = vsyncadd [#allocation3], 4294967072 }
  0x19   :  { %678 = dma.done.wait [#allocation6], 12544  }
  0x1a   :  { %679 = vsyncadd [#allocation6], 4294954752  ;;  %v74_v0 = vld [vmem:[#allocation5 + $0xf8] sm:$0xff]  ;;  %v73_v2 = vld [vmem:[#allocation5 + $0xf0] sm:$0xff]  ;;  %v686_v27 = vmov 1983009808   ;;  %v154_v29 = vlaneseq }
  0x1b   :  { %v58_v1 = vld [vmem:[#allocation5 + $0x78] sm:$0xff]  ;;  %491 = vmatprep.subr.mxu0 %v74_v0  ;;  %v57_v4 = vld [vmem:[#allocation5 + $0x70] sm:$0xff]  ;;  %v72_v6 = vld [vmem:[#allocation5 + $0xe8] sm:$0xff]  ;;  %v152_v28 = vunpack.c.l.s4 %v686_v27  ;;  %vm189_vm0 = vcmask 130048   ;;  %vm688_vm1 = vmmov 0   ;;  %s689_s24 = smov [#allocation7]  }
  0x1c   :  { %v106_v3 = vld [vmem:[#allocation5 + $0x1f8] sm:$0xff]  ;;  %492 = vmatpush3.msra.mxu0 %v58_v1  ;;  %v105_v7 = vld [vmem:[#allocation5 + $0x1f0] sm:$0xff]  ;;  %v56_v8 = vld [vmem:[#allocation5 + $0x68] sm:$0xff]  ;;  %v155_v39 = vshrl.u32 %v154_v29, 7  ;;  %s479_s25 = sshll.u32 %s689_s24, 4  ;;  %s480_s25 = int_to_ptr.vmem [resolvable:$true] %s479_s25 }
  0x1d   :  { %v90_v5 = vld [vmem:[#allocation5 + $0x178] sm:$0xff]  ;;  %526 = vmatprep.subr.mxu1 %v106_v3  ;;  %493 = vmatprep.subr.mxu0 %v73_v2  ;;  %v89_v9 = vld [vmem:[#allocation5 + $0x170] sm:$0xff]  ;;  %v104_v10 = vld [vmem:[#allocation5 + $0x1e8] sm:$0xff]  ;;  %v153_v38 = vunpack.c.0.s8 %v152_v28  ;;  %s656_s26 = scalar_lea.vmem %s480_s25, 32  ;;  %p661_p11 = scmp.lt.s32.totalorder %s480_s25, %s480_s25 }
  0x1e   :  { %527 = vmatpush3.msra.mxu1 %v90_v5  ;;  %494 = vmatpush3.msra.mxu0 %v57_v4  ;;  %v71_v11 = vld [vmem:[#allocation5 + $0xe0] sm:$0xff]  ;;  %v88_v12 = vld [vmem:[#allocation5 + $0x168] sm:$0xff]  ;;  %v70_v15 = vld [vmem:[#allocation5 + $0xd8] sm:$0xff]  ;;  %p657_p10 = scmp.ne.s32.totalorder %s480_s25, %s656_s26  ;;  %p662_p12 = scmp.lt.s32.totalorder %s656_s26, %s656_s26 }
  0x1f   :  { %528 = vmatprep.subr.mxu1 %v105_v7  ;;  %495 = vmatprep.subr.mxu0 %v72_v6  ;;  %v55_v13 = vld [vmem:[#allocation5 + $0x60] sm:$0xff]  ;;  %v54_v17 = vld [vmem:[#allocation5 + $0x58] sm:$0xff]  ;;  %v69_v19 = vld [vmem:[#allocation5 + $0xd0] sm:$0xff]  ;;  %v716_v48 = vsub.s32 %v153_v38, %v155_v39 }
  0x20   :  { %529 = vmatpush3.msra.mxu1 %v89_v9  ;;  %v103_v14 = vld [vmem:[#allocation5 + $0x1e0] sm:$0xff]  ;;  %496 = vmatpush3.msra.mxu0 %v56_v8  ;;  %v102_v18 = vld [vmem:[#allocation5 + $0x1d8] sm:$0xff]  ;;  %v53_v21 = vld [vmem:[#allocation5 + $0x50] sm:$0xff]  ;;  %p663_p13 = por %p662_p12, %p661_p11 }
  0x21   :  { %530 = vmatprep.subr.mxu1 %v104_v10  ;;  %v87_v16 = vld [vmem:[#allocation5 + $0x160] sm:$0xff]  ;;  %497 = vmatprep.subr.mxu0 %v71_v11  ;;  %v86_v20 = vld [vmem:[#allocation5 + $0x158] sm:$0xff]  ;;  %v101_v22 = vld [vmem:[#allocation5 + $0x1d0] sm:$0xff] }
  0x22   :  { %531 = vmatpush3.msra.mxu1 %v88_v12  ;;  %498 = vmatpush3.msra.mxu0 %v55_v13  ;;  %v68_v23 = vld [vmem:[#allocation5 + $0xc8] sm:$0xff]  ;;  %v85_v24 = vld [vmem:[#allocation5 + $0x150] sm:$0xff]  ;;  %v67_v30 = vld [vmem:[#allocation5 + $0xc0] sm:$0xff]  ;;  %p664_p0 = pnand %p663_p13, %p657_p10 }
  0x23   :  { %532 = vmatprep.subr.mxu1 %v103_v14  ;;  %499 = vmatprep.subr.mxu0 %v70_v15  ;;  %v52_v25 = vld [vmem:[#allocation5 + $0x48] sm:$0xff]  ;;  %v51_v32 = vld [vmem:[#allocation5 + $0x40] sm:$0xff]  ;;  %v66_v34 = vld [vmem:[#allocation5 + $0xb8] sm:$0xff] }
  0x24   :  { %533 = vmatpush3.msra.mxu1 %v87_v16  ;;  %500 = vmatpush3.msra.mxu0 %v54_v17  ;;  %v100_v26 = vld [vmem:[#allocation5 + $0x1c8] sm:$0xff]  ;;  %v99_v33 = vld [vmem:[#allocation5 + $0x1c0] sm:$0xff]  ;;  %v50_v36 = vld [vmem:[#allocation5 + $0x38] sm:$0xff] }
  0x25   :  { %534 = vmatprep.subr.mxu1 %v102_v18  ;;  %501 = vmatprep.subr.mxu0 %v69_v19  ;;  %v84_v31 = vld [vmem:[#allocation5 + $0x148] sm:$0xff]  ;;  %v83_v35 = vld [vmem:[#allocation5 + $0x140] sm:$0xff]  ;;  %v98_v37 = vld [vmem:[#allocation5 + $0x1b8] sm:$0xff] }
  0x26   :  { %535 = vmatpush3.msra.mxu1 %v86_v20  ;;  %502 = vmatpush3.msra.mxu0 %v53_v21  ;;  %v65_v40 = vld [vmem:[#allocation5 + $0xb0] sm:$0xff]  ;;  %v82_v41 = vld [vmem:[#allocation5 + $0x138] sm:$0xff]  ;;  %v64_v44 = vld [vmem:[#allocation5 + $0xa8] sm:$0xff] }
  0x27   :  { %536 = vmatprep.subr.mxu1 %v101_v22  ;;  %503 = vmatprep.subr.mxu0 %v68_v23  ;;  %v49_v42 = vld [vmem:[#allocation5 + $0x30] sm:$0xff]  ;;  %v48_v46 = vld [vmem:[#allocation5 + $0x28] sm:$0xff]  ;;  %v63_v49 = vld [vmem:[#allocation5 + $0xa0] sm:$0xff] }
  0x28   :  { %537 = vmatpush3.msra.mxu1 %v85_v24  ;;  %504 = vmatpush3.msra.mxu0 %v52_v25  ;;  %v97_v43 = vld [vmem:[#allocation5 + $0x1b0] sm:$0xff]  ;;  %v96_v47 = vld [vmem:[#allocation5 + $0x1a8] sm:$0xff]  ;;  %v47_v52 = vld [vmem:[#allocation5 + $0x20] sm:$0xff]  ;;  %v687_v25 = vmov 0.0  }
  0x29   :  { %538 = vmatprep.subr.mxu1 %v100_v26  ;;  %505 = vmatprep.subr.mxu0 %v67_v30  ;;  %v81_v45 = vld [vmem:[#allocation5 + $0x130] sm:$0xff]  ;;  %v80_v50 = vld [vmem:[#allocation5 + $0x128] sm:$0xff]  ;;  %v95_v53 = vld [vmem:[#allocation5 + $0x1a0] sm:$0xff] }
  0x2a   :  { %539 = vmatpush3.msra.mxu1 %v84_v31  ;;  %506 = vmatpush3.msra.mxu0 %v51_v32  ;;  %v41_v51 = vld [vmem:[#allocation2] sm:$0xff]  ;;  %v79_v55 = vld [vmem:[#allocation5 + $0x120] sm:$0xff]  ;;  %v60_v0 = vld [vmem:[#allocation5 + $0x88] sm:$0xff] }
  0x2b   :  { %540 = vmatprep.subr.mxu1 %v99_v33  ;;  %507 = vmatprep.subr.mxu0 %v66_v34  ;;  %v62_v54 = vld [vmem:[#allocation5 + $0x98] sm:$0xff]  ;;  %v157_v58 = vrot.slane %v41_v51, %v716_v48  ;;  %v150_v59 = vcombine.high %v41_v51, %v41_v51  ;;  %v61_v60 = vld [vmem:[#allocation5 + $0x90] sm:$0xff]  ;;  %v44_v2 = vld [vmem:[#allocation5 + $0x8] sm:$0xff] }
  0x2c   :  { %541 = vmatpush3.msra.mxu1 %v83_v35  ;;  %508 = vmatpush3.msra.mxu0 %v50_v36  ;;  %v46_v56 = vld [vmem:[#allocation5 + $0x18] sm:$0xff]  ;;  %v45_v62 = vld [vmem:[#allocation5 + $0x10] sm:$0xff]  ;;  %v92_v3 = vld [vmem:[#allocation5 + $0x188] sm:$0xff] }
  0x2d   :  { %542 = vmatprep.subr.mxu1 %v98_v37  ;;  %509 = vmatprep.subr.mxu0 %v65_v40  ;;  %v94_v57 = vld [vmem:[#allocation5 + $0x198] sm:$0xff]  ;;  %v93_v63 = vld [vmem:[#allocation5 + $0x190] sm:$0xff]  ;;  %v165_v4 = vcombine.high %v157_v58, %v157_v58  ;;  %v164_v5 = vrot.slane %v150_v59, %v716_v48  ;;  %v59_v6 = vld [vmem:[#allocation5 + $0x80] sm:$0xff] }
  0x2e   :  { %543 = vmatpush3.msra.mxu1 %v82_v41  ;;  %510 = vmatpush3.msra.mxu0 %v49_v42  ;;  %v78_v61 = vld [vmem:[#allocation5 + $0x118] sm:$0xff]  ;;  %v77_v1 = vld [vmem:[#allocation5 + $0x110] sm:$0xff]  ;;  %v43_v7 = vld [vmem:[#allocation5] sm:$0xff] }
  0x2f   :  { %544 = vmatprep.subr.mxu1 %v97_v43  ;;  %511 = vmatprep.subr.mxu0 %v64_v44  ;;  %v76_v8 = vld [vmem:[#allocation5 + $0x108] sm:$0xff]  ;;  %v91_v9 = vld [vmem:[#allocation5 + $0x180] sm:$0xff]  ;;  %v138_v10 = vld [vmem:[#allocation5 + $0x2f8] sm:$0xff]  ;;  %v166_v12 = vcombine.high %v164_v5, %v164_v5 }
  0x30   :  { %545 = vmatpush3.msra.mxu1 %v81_v45  ;;  %512 = vmatpush3.msra.mxu0 %v48_v46  ;;  %v75_v11 = vld [vmem:[#allocation5 + $0x100] sm:$0xff]  ;;  %v122_v13 = vld [vmem:[#allocation5 + $0x278] sm:$0xff]  ;;  %v137_v15 = vld [vmem:[#allocation5 + $0x2f0] sm:$0xff] }
  0x31   :  { %546 = vmatprep.subr.mxu1 %v96_v47  ;;  %513 = vmatprep.subr.mxu0 %v63_v49  ;;  %v42_v14 = vld [vmem:[#allocation2 + $0x8] sm:$0x3f]  ;;  %v121_v17 = vld [vmem:[#allocation5 + $0x270] sm:$0xff]  ;;  %v136_v18 = vld [vmem:[#allocation5 + $0x2e8] sm:$0xff] }
  0x32   :  { %547 = vmatpush3.msra.mxu1 %v80_v50  ;;  %514 = vmatpush3.msra.mxu0 %v47_v52  ;;  %v721_v16 = vrot.slane %v42_v14, %v716_v48  ;;  %v167_v19 = vcombine.high %v42_v14, %v42_v14  ;;  %v120_v21 = vld [vmem:[#allocation5 + $0x268] sm:$0xff]  ;;  %v135_v23 = vld [vmem:[#allocation5 + $0x2e0] sm:$0xff]  ;;  %v134_v27 = vld [vmem:[#allocation5 + $0x2d8] sm:$0xff] }
  0x33   :  { %548 = vmatprep.subr.mxu1 %v95_v53  ;;  %515 = vmatprep.subr.mxu0 %v62_v54  ;;  %v140_v22 = vld [vmem:[#allocation5 + $0x308] sm:$0xff]  ;;  %v119_v24 = vld [vmem:[#allocation5 + $0x260] sm:$0xff]  ;;  %v118_v29 = vld [vmem:[#allocation5 + $0x258] sm:$0xff] }
  0x34   :  { %549 = vmatpush3.msra.mxu1 %v79_v55  ;;  %516 = vmatpush3.msra.mxu0 %v46_v56  ;;  %v182_v20 = vcombine.high %v721_v16, %v721_v16  ;;  %v139_v26 = vld [vmem:[#allocation5 + $0x300] sm:$0xff]  ;;  %v181_v28 = vrot.slane %v167_v19, %v716_v48  ;;  %v133_v30 = vld [vmem:[#allocation5 + $0x2d0] sm:$0xff]  ;;  %v132_v32 = vld [vmem:[#allocation5 + $0x2c8] sm:$0xff] }
  0x35   :  { %550 = vmatprep.subr.mxu1 %v94_v57  ;;  %517 = vmatprep.subr.mxu0 %v61_v60  ;;  %v117_v31 = vld [vmem:[#allocation5 + $0x250] sm:$0xff]  ;;  %v116_v33 = vld [vmem:[#allocation5 + $0x248] sm:$0xff]  ;;  %v131_v34 = vld [vmem:[#allocation5 + $0x2c0] sm:$0xff] }
  0x36   :  { %551 = vmatpush3.msra.mxu1 %v78_v61  ;;  %518 = vmatpush3.msra.mxu0 %v45_v62  ;;  %v115_v35 = vld [vmem:[#allocation5 + $0x240] sm:$0xff]  ;;  %v130_v36 = vld [vmem:[#allocation5 + $0x2b8] sm:$0xff]  ;;  %v129_v38 = vld [vmem:[#allocation5 + $0x2b0] sm:$0xff] }
  0x37   :  { %552 = vmatprep.subr.mxu1 %v93_v63  ;;  %519 = vmatprep.subr.mxu0 %v60_v0  ;;  %v114_v37 = vld [vmem:[#allocation5 + $0x238] sm:$0xff]  ;;  %v113_v39 = vld [vmem:[#allocation5 + $0x230] sm:$0xff]  ;;  %v128_v40 = vld [vmem:[#allocation5 + $0x2a8] sm:$0xff] }
  0x38   :  { %553 = vmatpush3.msra.mxu1 %v77_v1  ;;  %520 = vmatpush3.msra.mxu0 %v44_v2  ;;  %v112_v41 = vld [vmem:[#allocation5 + $0x228] sm:$0xff]  ;;  %v127_v42 = vld [vmem:[#allocation5 + $0x2a0] sm:$0xff]  ;;  %v126_v44 = vld [vmem:[#allocation5 + $0x298] sm:$0xff] }
  0x39   :  { %554 = vmatprep.subr.mxu1 %v92_v3  ;;  %521 = vmatprep.subr.mxu0 %v59_v6  ;;  %v111_v43 = vld [vmem:[#allocation5 + $0x220] sm:$0xff]  ;;  %v110_v45 = vld [vmem:[#allocation5 + $0x218] sm:$0xff]  ;;  %v125_v46 = vld [vmem:[#allocation5 + $0x290] sm:$0xff] }
  0x3a   :  { %256 = vmatprep.mubr.f32.mxu0 %v165_v4  ;;  %522 = vmatpush3.msra.mxu0 %v43_v7  ;;  %v109_v47 = vld [vmem:[#allocation5 + $0x210] sm:$0xff]  ;;  %v124_v48 = vld [vmem:[#allocation5 + $0x288] sm:$0xff]  ;;  %v123_v50 = vld [vmem:[#allocation5 + $0x280] sm:$0xff] }
  0x3b   :  { %555 = vmatpush3.msra.mxu1 %v76_v8  ;;  %257 = vmatmul.mubr.f32.vlgmr.msra.gmra.mxu0 %v157_v58  ;;  %v108_v49 = vld [vmem:[#allocation5 + $0x208] sm:$0xff]  ;;  %v107_v51 = vld [vmem:[#allocation5 + $0x200] sm:$0xff]  ;;  %v489_v59 = vld [vmem:[%s735_s2] ss:$0 sm:$0xff] }
  0x3c   :  { %556 = vmatprep.subr.mxu1 %v91_v9  ;;  %561 = vmatprep.subr.mxu0 %v138_v10 }
  0x3d   :  { %557 = vmatpush3.msra.mxu1 %v75_v11  ;;  %326 = vmatprep.mubr.f32.mxu1 %v166_v12 }
  0x3e   :  { %562 = vmatpush3.msra.mxu0 %v122_v13  ;;  %327 = vmatmul.mubr.f32.vlgmr.msra.gmra.mxu1 %v164_v5 }
  0x3f   :  { %563 = vmatprep.subr.mxu0 %v137_v15  ;;  %396 = vmatprep.mubr.f32.mxu0 %v182_v20 }
  0x40   :  { %564 = vmatpush3.msra.mxu0 %v121_v17  ;;  %599 = vmatprep.subr.mxu1 %v687_v25 }
  0x41   :  { %565 = vmatprep.subr.mxu0 %v136_v18  ;;  %600 = vmatpush3.msra.mxu1 %v140_v22 }
  0x42   :  { %566 = vmatpush3.msra.mxu0 %v120_v21  ;;  %601 = vmatprep.subr.mxu1 %v687_v25 }
  0x43   :  { %567 = vmatprep.subr.mxu0 %v135_v23  ;;  %602 = vmatpush3.msra.mxu1 %v139_v26 }
  0x44   :  { %568 = vmatpush3.msra.mxu0 %v119_v24  ;;  %603 = vmatprep.mubr.msk.f32.mxu1 %vm688_vm1, %v687_v25 }
  0x45   :  { %569 = vmatprep.subr.mxu0 %v134_v27  ;;  %604 = vmatmul.mubr.msk.f32.vlgmr.msra.gmra.mxu1 %vm189_vm0, %v181_v28 }
  0x46   :  { %570 = vmatpush3.msra.mxu0 %v118_v29 }
  0x47   :  { %571 = vmatprep.subr.mxu0 %v133_v30 }
  0x48   :  { %572 = vmatpush3.msra.mxu0 %v117_v31 }
  0x49   :  { %573 = vmatprep.subr.mxu0 %v132_v32 }
  0x4a   :  { %574 = vmatpush3.msra.mxu0 %v116_v33 }
  0x4b   :  { %575 = vmatprep.subr.mxu0 %v131_v34 }
  0x4c   :  { %576 = vmatpush3.msra.mxu0 %v115_v35 }
  0x4d   :  { %577 = vmatprep.subr.mxu0 %v130_v36 }
  0x4e   :  { %578 = vmatpush3.msra.mxu0 %v114_v37 }
  0x4f   :  { %579 = vmatprep.subr.mxu0 %v129_v38 }
  0x50   :  { %580 = vmatpush3.msra.mxu0 %v113_v39 }
  0x51   :  { %581 = vmatprep.subr.mxu0 %v128_v40 }
  0x52   :  { %582 = vmatpush3.msra.mxu0 %v112_v41 }
  0x53   :  { %583 = vmatprep.subr.mxu0 %v127_v42 }
  0x54   :  { %584 = vmatpush3.msra.mxu0 %v111_v43 }
  0x55   :  { %585 = vmatprep.subr.mxu0 %v126_v44 }
  0x56   :  { %586 = vmatpush3.msra.mxu0 %v110_v45 }
  0x57   :  { %587 = vmatprep.subr.mxu0 %v125_v46 }
  0x58   :  { %588 = vmatpush3.msra.mxu0 %v109_v47 }
  0x59   :  { %589 = vmatprep.subr.mxu0 %v124_v48 }
  0x5a   :  { %590 = vmatpush3.msra.mxu0 %v108_v49 }
  0x5b   :  { %591 = vmatprep.subr.mxu0 %v123_v50 }
  0x5c   :  { %592 = vmatpush3.msra.mxu0 %v107_v51 }
  0x5d   :  { %397 = vmatmul.mubr.f32.vlgmr.msra.gmra.mxu0 %v721_v16 }
  0xfb   :  { %v523_v56 = vpop.f32.mrf.mxu0 }
  0xfd   :  { %v524_v57 = vpop.f32.mrf.mxu0 }
  0xfe   :  { %v558_v52 = vpop.f32.mrf.mxu1  ;;  %v525_v58 = vadd.f32 %v524_v57, %v523_v56 }
 0x100   :  { %v559_v53 = vpop.f32.mrf.mxu1  ;;  %v259_v60 = vadd.f32 %v525_v58, %v489_v59 }
 0x101   :  { %v560_v61 = vadd.f32 %v559_v53, %v558_v52 }
 0x103   :  { %v329_v0 = vadd.f32 %v560_v61, %v259_v60 }
 0x105   :  { %v468_v54 = vpop.f32.mrf.mxu1 }
 0x107   :  { %v605_v55 = vpop.f32.mrf.mxu1 }
 0x11d   :  { %v593_v62 = vpop.f32.mrf.mxu0 }
 0x11f   :  { %v594_v63 = vpop.f32.mrf.mxu0 }
 0x120   :  { %v595_v1 = vadd.f32 %v594_v63, %v593_v62 }
 0x122   :  { %v399_v2 = vadd.f32 %v595_v1, %v329_v0 }
 0x124   :  { %v469_v3 = vadd.f32 %v468_v54, %v399_v2 }
 0x126   :  { %472 = vst [vmem:[#allocation7] sm:$0x3] %v469_v3 }
 0x127   :  { %667 = shalt.err (!%p664_p0)
}
 0x128   :  { %482 = dma.vmem_to_hbm [thread:$0]  %s480_s25, 32, %s736_s3, [#allocation4]  }
 0x129   :  { %680 = dma.done.wait [#allocation4], 32  }
 0x12a   :  { %681 = vsyncadd [#allocation4], 4294967264 }
 0x12b   :  { %486 = vsyncpa [#allocation3], 1 }
 0x12c   :  { %487 = vsyncpa [#allocation6], 1 }
 0x12d   :  { %488 = vsyncpa [#allocation4], 1 }

</bundles_post_ra>
